<compile_context>
chip_gen: v7x
topology: tpu7x:2x2x1
jax: 0.10.0
libtpu: 0.0.40
codegen_flags: <defaults>
</compile_context>

<pallas_src>
import math

import jax
import jax.numpy as jnp
from jax.experimental import pallas as pl
from jax.experimental.pallas import tpu as pltpu


def _round_up(x, m):
    return ((x + m - 1) // m) * m


# ----------------------------------------------------------------------------
# Pallas kernel: fused LayerNorm(F) + Linear(F -> dm_padded)
# ----------------------------------------------------------------------------
def _ln_linear_kernel(x_ref, gamma_ref, beta_ref, wt_ref, b_ref, o_ref):
    x = x_ref[...].astype(jnp.float32)                         # [TM, F]
    # single-pass LN stats (biased var, eps=1e-5: matches torch.nn.LayerNorm)
    mean = jnp.mean(x, axis=-1, keepdims=True)
    ex2 = jnp.mean(x * x, axis=-1, keepdims=True)
    var = jnp.maximum(ex2 - mean * mean, 0.0)
    xn = (x - mean) * jax.lax.rsqrt(var + 1e-5)
    xn = (xn * gamma_ref[...] + beta_ref[...]).astype(jnp.bfloat16)
    # bf16 x bf16 -> f32 on the MXU (weights arrive pre-cast to bf16)
    y = jnp.dot(xn, wt_ref[...], preferred_element_type=jnp.float32)
    y = y + b_ref[...]                                         # f32 bias
    o_ref[...] = y.astype(o_ref.dtype)


def ln_linear_pallas(x_flat, gamma, beta, w_t, b):
    """x_flat: [M, F]; gamma/beta: [1, F]; w_t: [F, dm]; b: [1, dm]."""
    M, F = x_flat.shape
    dm = w_t.shape[1]

    # Lane-dense output: pad d_model (weight columns + bias) to a multiple of
    # 128 so the output block's last dim is a full lane width (unmasked vst,
    # dense writeback DMA).  No-op when dm % 128 == 0.
    dm_p = _round_up(dm, 128)
    if dm_p != dm:
        w_t = jnp.pad(w_t, ((0, 0), (0, dm_p - dm)))
        b = jnp.pad(b, ((0, 0), (0, dm_p - dm)))
    w_t = w_t.astype(jnp.bfloat16)

    # Row-tile sizing: as large as a conservative VMEM budget allows.
    # Budget = 16 MiB for (double-buffered in/out tiles + double-buffered
    # constant operands); vmem_limit set to 32 MiB (<= v7x physical 64 MiB,
    # <= v5e/v6e physical 128 MiB) leaving headroom for spills/scratch.
    const_bytes = 2 * (F * dm_p * 2 + 2 * F * 4 + dm_p * 4)
    tile_budget = max((16 << 20) - const_bytes, 2 << 20)
    tm_cap = max(8, min(1024, (tile_budget // (8 * (F + dm_p))) // 8 * 8))
    # Keep >= 2 grid steps when the row count allows it (v7x megacore).
    TM = min(tm_cap, max(8, _round_up(pl.cdiv(M, 2), 8)))
    Mp = _round_up(M, TM)
    if Mp != M:
        x_flat = jnp.pad(x_flat, ((0, Mp - M), (0, 0)))

    out = pl.pallas_call(
        _ln_linear_kernel,
        out_shape=jax.ShapeDtypeStruct((Mp, dm_p), x_flat.dtype),
        grid=(Mp // TM,),
        in_specs=[
            pl.BlockSpec((TM, F), lambda i: (i, 0)),
            pl.BlockSpec((1, F), lambda i: (0, 0)),
            pl.BlockSpec((1, F), lambda i: (0, 0)),
            pl.BlockSpec((F, dm_p), lambda i: (0, 0)),
            pl.BlockSpec((1, dm_p), lambda i: (0, 0)),
        ],
        out_specs=pl.BlockSpec((TM, dm_p), lambda i: (i, 0)),
        compiler_params=pltpu.CompilerParams(
            dimension_semantics=("parallel",),
            vmem_limit_bytes=32 * 1024 * 1024,
        ),
    )(x_flat, gamma, beta, w_t, b)
    return out[:M, :dm]


# ----------------------------------------------------------------------------
# SegMerging forward.
#   merged rows == reshape of [x0 * (win-1), x, trailing-pad] along segments:
#     row 0        = x0 tiled win times               (cls row)
#     row r (r>=1) = segments 1+(r-1)*win .. r*win    (body rows)
#   so a single concatenate + a free reshape replaces tile + double concat.
# ----------------------------------------------------------------------------
def seg_merging_forward(x, params, win_size):
    B, D, L, dm = x.shape
    pad_num = (L - 1) % win_size

    pieces = []
    if win_size > 1:
        pieces.append(jnp.broadcast_to(x[:, :, 0:1, :], (B, D, win_size - 1, dm)))
    pieces.append(x)
    if pad_num != 0:
        pad = win_size - pad_num
        pieces.append(x[:, :, L - pad:, :])      # replicate trailing segments
    xd = jnp.concatenate(pieces, axis=2) if len(pieces) > 1 else x

    S = xd.shape[2]
    assert S % win_size == 0
    L_out = S // win_size
    F = win_size * dm
    flat = xd.reshape(B * D * L_out, F)          # free, contiguous reshape

    out = ln_linear_pallas(flat, params["gamma"], params["beta"],
                           params["w_t"], params["b"])
    return out.reshape(B, D, L_out, dm)


# ----------------------------------------------------------------------------
# Encoder: scale_block 0 (win_size=1, no merge) + (e_blocks-1) merging blocks
# ----------------------------------------------------------------------------
def init_encoder_params(key, e_blocks, win_size, d_model):
    params = []
    fan_in = win_size * d_model
    bound = 1.0 / math.sqrt(fan_in)
    for _ in range(1, e_blocks):
        k0, k1, k2, k3, key = jax.random.split(key, 5)
        p = {
            # LayerNorm(win*d_model): deterministic but non-trivial init
            "gamma": 1.0 + 0.1 * jax.random.normal(k0, (1, fan_in), jnp.float32),
            "beta": 0.1 * jax.random.normal(k1, (1, fan_in), jnp.float32),
            # nn.Linear(win*d_model, d_model): stored pre-transposed [F, d_model]
            "w_t": jax.random.uniform(k2, (fan_in, d_model), jnp.float32, -bound, bound),
            "b": jax.random.uniform(k3, (1, d_model), jnp.float32, -bound, bound),
        }
        params.append(p)
    return params


def encoder_forward(x, params, win_size):
    # block 0: scale_block(win_size=1), depth=0 -> identity
    # blocks 1..e_blocks-1: SegMerging(win_size) (+ depth TSA layers, depth=0)
    for p in params:
        x = seg_merging_forward(x, p, win_size)
    return x


# ----------------------------------------------------------------------------
# Pure-JAX reference (mirrors the torch SegMerging literally, f32 matmul)
# ----------------------------------------------------------------------------
def _seg_merging_ref(x, p, win):
    B, D, L, dm = x.shape
    pad_num = (L - 1) % win
    if pad_num != 0:
        pad = win - pad_num
        x = jnp.concatenate([x, x[:, :, -pad:, :]], axis=2)
    cls = jnp.concatenate([x[:, :, 0, :]] * win, axis=-1)               # [B,D,F]
    body = jnp.concatenate([x[:, :, i::win, :] for i in range(1, win + 1)], axis=-1)
    merged = jnp.concatenate([cls[:, :, None, :], body], axis=2)        # [B,D,L',F]
    mean = merged.mean(-1, keepdims=True)
    var = ((merged - mean) ** 2).mean(-1, keepdims=True)
    xn = (merged - mean) / jnp.sqrt(var + 1e-5) * p["gamma"] + p["beta"]
    return xn @ p["w_t"] + p["b"]


if __name__ == "__main__":
    # Small config consistent with the module defaults
    e_blocks = 3
    win_size = 2
    d_model = 32
    in_seg_num = 10          # exercises the padding path: 10 -> 6 -> 4 segments
    B, ts_d = 2, 4

    key = jax.random.PRNGKey(0)
    kx, kp = jax.random.split(key)
    x = jax.random.normal(kx, (B, ts_d, in_seg_num, d_model), jnp.float32)
    params = init_encoder_params(kp, e_blocks, win_size, d_model)

    fwd = jax.jit(lambda xx, pp: encoder_forward(xx, pp, win_size))
    out = jax.block_until_ready(fwd(x, params))

    # Sanity check against a pure-f32 JAX reference.  The kernel uses bf16
    # MXU operands, so tolerance is set at a bf16-appropriate 2e-2.
    ref = x
    for p in params:
        ref = _seg_merging_ref(ref, p, win_size)
    assert out.shape == ref.shape, (out.shape, ref.shape)
    assert jnp.allclose(out, ref, atol=2e-2, rtol=2e-2), \
        float(jnp.max(jnp.abs(out - ref)))

    print("KERNEL_OK")
</pallas_src>

<mosaic_0001>
module attributes {stable_mosaic.version = 11 : i64} {
  func.func @_ln_linear_kernel(%arg0: i32, %arg1: memref<24x64xf32, #tpu.memory_space<vmem>>, %arg2: memref<1x64xf32, #tpu.memory_space<vmem>>, %arg3: memref<1x64xf32, #tpu.memory_space<vmem>>, %arg4: memref<64x128xbf16, #tpu.memory_space<vmem>>, %arg5: memref<1x128xf32, #tpu.memory_space<vmem>>, %arg6: memref<24x128xf32, #tpu.memory_space<vmem>>) attributes {dimension_semantics = [#tpu.dimension_semantics<parallel>], iteration_bounds = array<i64: 2>, scalar_prefetch = 0 : i64, scratch_operands = 0 : i64, tpu.core_type = #tpu.core_type<tc>, window_params = [{transform_indices = @transform_0, window_bounds = array<i64: 24, 64>}, {pipeline_mode = #tpu.pipeline_mode<synchronous>, transform_indices = @transform_1, window_bounds = array<i64: 1, 64>}, {pipeline_mode = #tpu.pipeline_mode<synchronous>, transform_indices = @transform_2, window_bounds = array<i64: 1, 64>}, {pipeline_mode = #tpu.pipeline_mode<synchronous>, transform_indices = @transform_3, window_bounds = array<i64: 64, 128>}, {pipeline_mode = #tpu.pipeline_mode<synchronous>, transform_indices = @transform_4, window_bounds = array<i64: 1, 128>}, {transform_indices = @transform_5, window_bounds = array<i64: 24, 128>}]} {
    %c0 = arith.constant 0 : index
    %c0_0 = arith.constant 0 : index
    %0 = vector.load %arg1[%c0, %c0_0] : memref<24x64xf32, #tpu.memory_space<vmem>>, vector<24x64xf32>
    %cst = arith.constant dense<0.000000e+00> : vector<24xf32>
    %1 = vector.multi_reduction <add>, %0, %cst [1] : vector<24x64xf32> to vector<24xf32>
    %2 = vector.shape_cast %1 : vector<24xf32> to vector<24x1xf32>
    %cst_1 = arith.constant 6.400000e+01 : f32
    %3 = vector.broadcast %cst_1 : f32 to vector<24x1xf32>
    %4 = arith.divf %2, %3 : vector<24x1xf32>
    %5 = arith.mulf %0, %0 : vector<24x64xf32>
    %cst_2 = arith.constant dense<0.000000e+00> : vector<24xf32>
    %6 = vector.multi_reduction <add>, %5, %cst_2 [1] : vector<24x64xf32> to vector<24xf32>
    %7 = vector.shape_cast %6 : vector<24xf32> to vector<24x1xf32>
    %cst_3 = arith.constant 6.400000e+01 : f32
    %8 = vector.broadcast %cst_3 : f32 to vector<24x1xf32>
    %9 = arith.divf %7, %8 : vector<24x1xf32>
    %10 = arith.mulf %4, %4 : vector<24x1xf32>
    %11 = arith.subf %9, %10 : vector<24x1xf32>
    %cst_4 = arith.constant 0.000000e+00 : f32
    %12 = vector.broadcast %cst_4 : f32 to vector<24x1xf32>
    %13 = arith.maximumf %11, %12 : vector<24x1xf32>
    %14 = vector.broadcast %4 : vector<24x1xf32> to vector<24x64xf32>
    %15 = arith.subf %0, %14 : vector<24x64xf32>
    %cst_5 = arith.constant 9.99999974E-6 : f32
    %16 = vector.broadcast %cst_5 : f32 to vector<24x1xf32>
    %17 = arith.addf %13, %16 : vector<24x1xf32>
    %18 = math.rsqrt %17 : vector<24x1xf32>
    %19 = vector.broadcast %18 : vector<24x1xf32> to vector<24x64xf32>
    %20 = arith.mulf %15, %19 : vector<24x64xf32>
    %c0_6 = arith.constant 0 : index
    %c0_7 = arith.constant 0 : index
    %21 = vector.load %arg2[%c0_6, %c0_7] : memref<1x64xf32, #tpu.memory_space<vmem>>, vector<1x64xf32>
    %22 = vector.broadcast %21 : vector<1x64xf32> to vector<24x64xf32>
    %23 = arith.mulf %20, %22 : vector<24x64xf32>
    %c0_8 = arith.constant 0 : index
    %c0_9 = arith.constant 0 : index
    %24 = vector.load %arg3[%c0_8, %c0_9] : memref<1x64xf32, #tpu.memory_space<vmem>>, vector<1x64xf32>
    %25 = vector.broadcast %24 : vector<1x64xf32> to vector<24x64xf32>
    %26 = arith.addf %23, %25 : vector<24x64xf32>
    %27 = arith.truncf %26 : vector<24x64xf32> to vector<24x64xbf16>
    %c0_10 = arith.constant 0 : index
    %c0_11 = arith.constant 0 : index
    %28 = vector.load %arg4[%c0_10, %c0_11] : memref<64x128xbf16, #tpu.memory_space<vmem>>, vector<64x128xbf16>
    %cst_12 = arith.constant dense<0.000000e+00> : vector<24x128xf32>
    %29 = tpu.matmul %27, %28, %cst_12 {dimension_numbers = #tpu.dot_dimension_numbers<[1], [0], [0], [1], [0, 0, 1, 1], [], []>} : vector<24x64xbf16>, vector<64x128xbf16>, vector<24x128xf32> -> vector<24x128xf32>
    %c0_13 = arith.constant 0 : index
    %c0_14 = arith.constant 0 : index
    %30 = vector.load %arg5[%c0_13, %c0_14] : memref<1x128xf32, #tpu.memory_space<vmem>>, vector<1x128xf32>
    %31 = vector.broadcast %30 : vector<1x128xf32> to vector<24x128xf32>
    %32 = arith.addf %29, %31 : vector<24x128xf32>
    %c0_15 = arith.constant 0 : index
    %c0_16 = arith.constant 0 : index
    %33 = vector.load %arg6[%c0_15, %c0_16] : memref<24x128xf32, #tpu.memory_space<vmem>>, vector<24x128xf32>
    tpu.vector_store %arg6[%c0_15, %c0_16], %32 {strides = array<i32>} : memref<24x128xf32, #tpu.memory_space<vmem>>, vector<24x128xf32>,
    return
  }
  func.func @transform_0(%arg0: i32) -> (i32, i32) {
    %c0_i32 = arith.constant 0 : i32
    %c0_i32_0 = arith.constant 0 : i32
    return %arg0, %c0_i32 : i32, i32
  }
  func.func @transform_1(%arg0: i32) -> (i32, i32) {
    %c0_i32 = arith.constant 0 : i32
    %c0_i32_0 = arith.constant 0 : i32
    %c0_i32_1 = arith.constant 0 : i32
    return %c0_i32, %c0_i32_0 : i32, i32
  }
  func.func @transform_2(%arg0: i32) -> (i32, i32) {
    %c0_i32 = arith.constant 0 : i32
    %c0_i32_0 = arith.constant 0 : i32
    %c0_i32_1 = arith.constant 0 : i32
    return %c0_i32, %c0_i32_0 : i32, i32
  }
  func.func @transform_3(%arg0: i32) -> (i32, i32) {
    %c0_i32 = arith.constant 0 : i32
    %c0_i32_0 = arith.constant 0 : i32
    %c0_i32_1 = arith.constant 0 : i32
    return %c0_i32, %c0_i32_0 : i32, i32
  }
  func.func @transform_4(%arg0: i32) -> (i32, i32) {
    %c0_i32 = arith.constant 0 : i32
    %c0_i32_0 = arith.constant 0 : i32
    %c0_i32_1 = arith.constant 0 : i32
    return %c0_i32, %c0_i32_0 : i32, i32
  }
  func.func @transform_5(%arg0: i32) -> (i32, i32) {
    %c0_i32 = arith.constant 0 : i32
    %c0_i32_0 = arith.constant 0 : i32
    return %arg0, %c0_i32 : i32, i32
  }
}

module attributes {stable_mosaic.version = 11 : i64} {
  func.func @_ln_linear_kernel(%arg0: i32, %arg1: memref<16x64xf32, #tpu.memory_space<vmem>>, %arg2: memref<1x64xf32, #tpu.memory_space<vmem>>, %arg3: memref<1x64xf32, #tpu.memory_space<vmem>>, %arg4: memref<64x128xbf16, #tpu.memory_space<vmem>>, %arg5: memref<1x128xf32, #tpu.memory_space<vmem>>, %arg6: memref<16x128xf32, #tpu.memory_space<vmem>>) attributes {dimension_semantics = [#tpu.dimension_semantics<parallel>], iteration_bounds = array<i64: 2>, scalar_prefetch = 0 : i64, scratch_operands = 0 : i64, tpu.core_type = #tpu.core_type<tc>, window_params = [{transform_indices = @transform_0, window_bounds = array<i64: 16, 64>}, {pipeline_mode = #tpu.pipeline_mode<synchronous>, transform_indices = @transform_1, window_bounds = array<i64: 1, 64>}, {pipeline_mode = #tpu.pipeline_mode<synchronous>, transform_indices = @transform_2, window_bounds = array<i64: 1, 64>}, {pipeline_mode = #tpu.pipeline_mode<synchronous>, transform_indices = @transform_3, window_bounds = array<i64: 64, 128>}, {pipeline_mode = #tpu.pipeline_mode<synchronous>, transform_indices = @transform_4, window_bounds = array<i64: 1, 128>}, {transform_indices = @transform_5, window_bounds = array<i64: 16, 128>}]} {
    %c0 = arith.constant 0 : index
    %c0_0 = arith.constant 0 : index
    %0 = vector.load %arg1[%c0, %c0_0] : memref<16x64xf32, #tpu.memory_space<vmem>>, vector<16x64xf32>
    %cst = arith.constant dense<0.000000e+00> : vector<16xf32>
    %1 = vector.multi_reduction <add>, %0, %cst [1] : vector<16x64xf32> to vector<16xf32>
    %2 = vector.shape_cast %1 : vector<16xf32> to vector<16x1xf32>
    %cst_1 = arith.constant 6.400000e+01 : f32
    %3 = vector.broadcast %cst_1 : f32 to vector<16x1xf32>
    %4 = arith.divf %2, %3 : vector<16x1xf32>
    %5 = arith.mulf %0, %0 : vector<16x64xf32>
    %cst_2 = arith.constant dense<0.000000e+00> : vector<16xf32>
    %6 = vector.multi_reduction <add>, %5, %cst_2 [1] : vector<16x64xf32> to vector<16xf32>
    %7 = vector.shape_cast %6 : vector<16xf32> to vector<16x1xf32>
    %cst_3 = arith.constant 6.400000e+01 : f32
    %8 = vector.broadcast %cst_3 : f32 to vector<16x1xf32>
    %9 = arith.divf %7, %8 : vector<16x1xf32>
    %10 = arith.mulf %4, %4 : vector<16x1xf32>
    %11 = arith.subf %9, %10 : vector<16x1xf32>
    %cst_4 = arith.constant 0.000000e+00 : f32
    %12 = vector.broadcast %cst_4 : f32 to vector<16x1xf32>
    %13 = arith.maximumf %11, %12 : vector<16x1xf32>
    %14 = vector.broadcast %4 : vector<16x1xf32> to vector<16x64xf32>
    %15 = arith.subf %0, %14 : vector<16x64xf32>
    %cst_5 = arith.constant 9.99999974E-6 : f32
    %16 = vector.broadcast %cst_5 : f32 to vector<16x1xf32>
    %17 = arith.addf %13, %16 : vector<16x1xf32>
    %18 = math.rsqrt %17 : vector<16x1xf32>
    %19 = vector.broadcast %18 : vector<16x1xf32> to vector<16x64xf32>
    %20 = arith.mulf %15, %19 : vector<16x64xf32>
    %c0_6 = arith.constant 0 : index
    %c0_7 = arith.constant 0 : index
    %21 = vector.load %arg2[%c0_6, %c0_7] : memref<1x64xf32, #tpu.memory_space<vmem>>, vector<1x64xf32>
    %22 = vector.broadcast %21 : vector<1x64xf32> to vector<16x64xf32>
    %23 = arith.mulf %20, %22 : vector<16x64xf32>
    %c0_8 = arith.constant 0 : index
    %c0_9 = arith.constant 0 : index
    %24 = vector.load %arg3[%c0_8, %c0_9] : memref<1x64xf32, #tpu.memory_space<vmem>>, vector<1x64xf32>
    %25 = vector.broadcast %24 : vector<1x64xf32> to vector<16x64xf32>
    %26 = arith.addf %23, %25 : vector<16x64xf32>
    %27 = arith.truncf %26 : vector<16x64xf32> to vector<16x64xbf16>
    %c0_10 = arith.constant 0 : index
    %c0_11 = arith.constant 0 : index
    %28 = vector.load %arg4[%c0_10, %c0_11] : memref<64x128xbf16, #tpu.memory_space<vmem>>, vector<64x128xbf16>
    %cst_12 = arith.constant dense<0.000000e+00> : vector<16x128xf32>
    %29 = tpu.matmul %27, %28, %cst_12 {dimension_numbers = #tpu.dot_dimension_numbers<[1], [0], [0], [1], [0, 0, 1, 1], [], []>} : vector<16x64xbf16>, vector<64x128xbf16>, vector<16x128xf32> -> vector<16x128xf32>
    %c0_13 = arith.constant 0 : index
    %c0_14 = arith.constant 0 : index
    %30 = vector.load %arg5[%c0_13, %c0_14] : memref<1x128xf32, #tpu.memory_space<vmem>>, vector<1x128xf32>
    %31 = vector.broadcast %30 : vector<1x128xf32> to vector<16x128xf32>
    %32 = arith.addf %29, %31 : vector<16x128xf32>
    %c0_15 = arith.constant 0 : index
    %c0_16 = arith.constant 0 : index
    %33 = vector.load %arg6[%c0_15, %c0_16] : memref<16x128xf32, #tpu.memory_space<vmem>>, vector<16x128xf32>
    tpu.vector_store %arg6[%c0_15, %c0_16], %32 {strides = array<i32>} : memref<16x128xf32, #tpu.memory_space<vmem>>, vector<16x128xf32>,
    return
  }
  func.func @transform_0(%arg0: i32) -> (i32, i32) {
    %c0_i32 = arith.constant 0 : i32
    %c0_i32_0 = arith.constant 0 : i32
    return %arg0, %c0_i32 : i32, i32
  }
  func.func @transform_1(%arg0: i32) -> (i32, i32) {
    %c0_i32 = arith.constant 0 : i32
    %c0_i32_0 = arith.constant 0 : i32
    %c0_i32_1 = arith.constant 0 : i32
    return %c0_i32, %c0_i32_0 : i32, i32
  }
  func.func @transform_2(%arg0: i32) -> (i32, i32) {
    %c0_i32 = arith.constant 0 : i32
    %c0_i32_0 = arith.constant 0 : i32
    %c0_i32_1 = arith.constant 0 : i32
    return %c0_i32, %c0_i32_0 : i32, i32
  }
  func.func @transform_3(%arg0: i32) -> (i32, i32) {
    %c0_i32 = arith.constant 0 : i32
    %c0_i32_0 = arith.constant 0 : i32
    %c0_i32_1 = arith.constant 0 : i32
    return %c0_i32, %c0_i32_0 : i32, i32
  }
  func.func @transform_4(%arg0: i32) -> (i32, i32) {
    %c0_i32 = arith.constant 0 : i32
    %c0_i32_0 = arith.constant 0 : i32
    %c0_i32_1 = arith.constant 0 : i32
    return %c0_i32, %c0_i32_0 : i32, i32
  }
  func.func @transform_5(%arg0: i32) -> (i32, i32) {
    %c0_i32 = arith.constant 0 : i32
    %c0_i32_0 = arith.constant 0 : i32
    return %arg0, %c0_i32 : i32, i32
  }
}

</mosaic_0001>

<bundles_post_ra>
// kernel: _lambda_.2
= control target key start
LH: loop header
LB: loop body
LE: loop exit
PB: predicated region body
PF: predicated region fallthrough
CT: control target
= control target key end

     0   :  { %s548_s18 = smov 0   ;;  %s613_s0 = inlined_call_operand.vmem [shape: f32[48,64], index: 0, kind: input, shape index: {}]   ;;  %s614_s1 = inlined_call_operand.vmem [shape: f32[1,64], index: 1, kind: input, shape index: {}]   ;;  %s615_s2 = inlined_call_operand.vmem [shape: f32[1,64], index: 2, kind: input, shape index: {}]   ;;  %s616_s3 = inlined_call_operand.vmem [shape: bf16[64,128], index: 3, kind: input, shape index: {}]   ;;  %s617_s4 = inlined_call_operand.vmem [shape: f32[1,128], index: 4, kind: input, shape index: {}]   ;;  %s618_s5 = inlined_call_operand.vmem [shape: f32[48,128], index: 5, kind: output, shape index: {}]  }
   0x1 LB: > { %s456_s19 = sadd.s32 4294967295, %s516_s18   ;;  %p460_p0 = scmp.ge.s32.totalorder %s516_s18, 1  ;;  %s516_s18 = sphi %s548_s18, %s15_s18  }
   0x2   : > { %p188_p1 = scmp.lt.s32.totalorder %s516_s18, 3 }
   0x4   : > { %p189_p2 = pnand %p460_p0, %p188_p1 }
   0x5   : > { %s216_s20 = smul.u32 (!%p189_p2), 3, %s456_s19  ;;  %vm232_vm0 = vcmask (!%p189_p2), 523264   ;;  %v500_v12 = vld [vmem:[%s616_s3] sm:$0xff] (!%p189_p2)   ;;  %v501_v13 = vld [vmem:[%s616_s3 + $0x8] sm:$0xff] (!%p189_p2)   ;;  %v502_v14 = vld [vmem:[%s616_s3 + $0x10] sm:$0xff] (!%p189_p2)  }
   0x6   : > { %192 = sbr.rel (%p189_p2) target bundleno = 415 (0x19f), region = 40  ;;  %480 = vmatprep.subr.bf16.mxu0 (!%p189_p2), %v500_v12  ;;  %v503_v15 = vld [vmem:[%s616_s3 + $0x18] sm:$0xff] (!%p189_p2)   ;;  %v463_v44 = vld [vmem:[%s614_s1] ss:$0 sm:$0xff] (!%p189_p2) }
   0x7   : > { %p217_p3 = scmp.lt.s32.totalorder (!%p189_p2), %s216_s20, 5  ;;  %481 = vmatpush3.bf16.msra.mxu0 (!%p189_p2), %v500_v12  ;;  %v464_v51 = vld [vmem:[%s615_s2] ss:$0 sm:$0xff] (!%p189_p2) }
   0x8   : > { %482 = vmatprep.subr.bf16.mxu0 (!%p189_p2), %v501_v13  ;;  %v465_v59 = vld [vmem:[%s617_s4] ss:$0 sm:$0xff] (!%p189_p2) }
   0xb   : > { %483 = vmatpush3.bf16.msra.mxu0 (!%p189_p2), %v501_v13 }
   0xc   : > { %484 = vmatprep.subr.bf16.mxu0 (!%p189_p2), %v502_v14 }
   0xd   : > { %s620_s20 = smov (!%p217_p3, %s216_s20), 5 }
   0xe   : > { %s461_s21 = sshll.u32 %s620_s20, 3 }
   0xf   : > { %s220_s24 = scalar_lea.vmem %s613_s0, %s461_s21  ;;  %485 = vmatpush3.bf16.msra.mxu0 %v502_v14  ;;  %s226_s16 = scalar_lea.vmem %s618_s5, %s461_s21 }
  0x10   : > { %v564_v0 = vld [vmem:[%s220_s24 + $0x10] sm:$0xff]  ;;  %v229_v1 = vld [vmem:[%s220_s24] sm:$0xff]  ;;  %v566_v2 = vld [vmem:[%s220_s24 + $0x8] sm:$0xff]  ;;  %486 = vmatprep.subr.bf16.mxu0 %v503_v15 }
  0x11   : > { %v239_v3 = vsel %vm232_vm0, %v564_v0, 0.0  ;;  %v233_v4 = vsel %vm232_vm0, %v229_v1, 0.0  ;;  %v246_v5 = vmul.f32 %v229_v1, %v229_v1  ;;  %v236_v7 = vsel %vm232_vm0, %v566_v2, 0.0 }
  0x12   : > { %240 = vadd.xlane.f32.xlu1 %v239_v3  ;;  %234 = vadd.xlane.f32.xlu0 %v233_v4  ;;  %v248_v8 = vmul.f32 %v564_v0, %v564_v0  ;;  %v247_v9 = vmul.f32 %v566_v2, %v566_v2 }
  0x13   : > { %v249_v6 = vsel %vm232_vm0, %v246_v5, 0.0  ;;  %487 = vmatpush3.bf16.msra.mxu0 %v503_v15 }
  0x14   : > { %v255_v10 = vsel %vm232_vm0, %v248_v8, 0.0  ;;  %v252_v11 = vsel %vm232_vm0, %v247_v9, 0.0 }
  0x16   : > { %250 = vadd.xlane.f32.xlu1 %v249_v6  ;;  %237 = vadd.xlane.f32.xlu0 %v236_v7 }
  0x1a   : > { %256 = vadd.xlane.f32.xlu1 %v255_v10  ;;  %253 = vadd.xlane.f32.xlu0 %v252_v11 }
  0x9f   : > { %v241_v16 = vpop.xlane.xlu1 %240  ;;  %v235_v17 = vpop.xlane.xlu0 %234 }
  0xa0   : > { %v243_v18 = vmul.f32 0.015625, %v235_v17  ;;  %v245_v19 = vmul.f32 0.015625, %v241_v16 }
  0xa2   : > { %v261_v22 = vmul.f32 %v243_v18, %v243_v18  ;;  %v263_v26 = vmul.f32 %v245_v19, %v245_v19  ;;  %v270_v41 = vsub.f32 %v229_v1, %v243_v18  ;;  %v272_v43 = vsub.f32 %v564_v0, %v245_v19 }
  0xa3   : > { %v251_v20 = vpop.xlane.xlu1 %250  ;;  %v238_v21 = vpop.xlane.xlu0 %237 }
  0xa4   : > { %v258_v23 = vmul.f32 0.015625, %v251_v20  ;;  %v244_v24 = vmul.f32 0.015625, %v238_v21 }
  0xa6   : > { %v264_v25 = vsub.f32 %v258_v23, %v261_v22  ;;  %v262_v30 = vmul.f32 %v244_v24, %v244_v24  ;;  %v271_v46 = vsub.f32 %v566_v2, %v244_v24 }
  0xa7   : > { %v257_v27 = vpop.xlane.xlu1 %256  ;;  %v254_v28 = vpop.xlane.xlu0 %253 }
  0xa8   : > { %v267_v29 = vmax.f32 %v264_v25, 0.0  ;;  %v260_v31 = vmul.f32 0.015625, %v257_v27  ;;  %v259_v32 = vmul.f32 0.015625, %v254_v28 }
  0xaa   : > { %v273_v33 = vadd.f32 1e-05, %v267_v29  ;;  %v266_v34 = vsub.f32 %v260_v31, %v263_v26  ;;  %v265_v35 = vsub.f32 %v259_v32, %v262_v30 }
  0xac   : > { %504 = vrsqrt.f32 %v273_v33  ;;  %v269_v36 = vmax.f32 %v266_v34, 0.0  ;;  %v268_v37 = vmax.f32 %v265_v35, 0.0 }
  0xae   : > { %v275_v38 = vadd.f32 1e-05, %v269_v36  ;;  %v274_v39 = vadd.f32 1e-05, %v268_v37 }
  0xb0   : > { %506 = vrsqrt.f32 %v275_v38 }
  0xb1   : > { %508 = vrsqrt.f32 %v274_v39 }
  0xb6   : > { %v505_v40 = vpop.eup %504 }
  0xb7   : > { %v279_v42 = vmul.f32 %v505_v40, %v270_v41 }
  0xb9   : > { %v289_v50 = vmul.f32 %v463_v44, %v279_v42 }
  0xba   : > { %v507_v45 = vpop.eup %506 }
  0xbb   : > { %v509_v47 = vpop.eup %508  ;;  %v281_v48 = vmul.f32 %v507_v45, %v272_v43  ;;  %v299_v55 = vadd.f32 %v464_v51, %v289_v50 }
  0xbc   : > { %v280_v49 = vmul.f32 %v509_v47, %v271_v46 }
  0xbd   : > { %v291_v52 = vmul.f32 %v463_v44, %v281_v48 }
  0xbe   : > { %v290_v53 = vmul.f32 %v463_v44, %v280_v49 }
  0xbf   : > { %v301_v54 = vadd.f32 %v464_v51, %v291_v52 }
  0xc0   : > { %v300_v56 = vadd.f32 %v464_v51, %v290_v53 }
  0xc1   : > { %v303_v57 = vpack.c.bf16 %v301_v54, %v301_v54 }
  0xc2   : > { %v302_v58 = vpack.c.bf16 %v300_v56, %v299_v55 }
  0xc4   : > { %488 = vmatprep.mubr.msk.bf16.mxu0 %vm232_vm0, %v302_v58 }
  0xc5   : > { %489 = vmatmul.mubr.msk.bf16.vlgmr.msra.gmra.mrb[0].mxu0 %vm232_vm0, %v303_v57 }
 0x198   : > { %v490_v60 = vpop.f32.mrb[0].mxu0 }
 0x199   : > { %v392_v61 = vadd.f32 %v490_v60, %v465_v59  ;;  %v383_v62 = vpop.f32.mrb[1].mxu0 }
 0x19a   : > { %v384_v63 = vadd.f32 %v465_v59, %v383_v62  ;;  %v491_v0 = vpop.f32.mrb[2].mxu0 }
 0x19b   : > { %399 = vst [vmem:[%s226_s16 + $0x10] sm:$0xff] %v392_v61  ;;  %v386_v1 = vpop.f32.mrb[3].mxu0 }
 0x19c   : > { %397 = vst [vmem:[%s226_s16] sm:$0xff] %v384_v63  ;;  %v387_v2 = vadd.f32 %v465_v59, %v386_v1 }
 0x19e   : > { %398 = vst [vmem:[%s226_s16 + $0x8] sm:$0xff] %v387_v2 }
 0x19f PF: > { %s15_s18 = sadd.s32 1, %s516_s18  }
 0x1a0   : > { %p12_p4 = scmp.ge.s32.totalorder %s15_s18, 4  }
 0x1a2   :  { %14 = sbr.rel (!%p12_p4) target bundleno = 1 (0x1), region = 70 }

// kernel: _lambda_.3
= control target key start
LH: loop header
LB: loop body
LE: loop exit
PB: predicated region body
PF: predicated region fallthrough
CT: control target
= control target key end

     0   :  { %10 = vsyncpa [#allocation3], 0  ;;  %s759_s0 = inlined_call_operand.vmem [shape: f32[32,64], index: 0, kind: input, shape index: {}]   ;;  %s760_s1 = inlined_call_operand.vmem [shape: f32[1,64], index: 1, kind: input, shape index: {}]   ;;  %s761_s2 = inlined_call_operand.vmem [shape: f32[1,64], index: 2, kind: input, shape index: {}]   ;;  %s762_s3 = inlined_call_operand.vmem [shape: bf16[64,128], index: 3, kind: input, shape index: {}]   ;;  %s763_s4 = inlined_call_operand.vmem [shape: f32[1,128], index: 4, kind: input, shape index: {}]   ;;  %s764_s5 = inlined_call_operand.hbm [shape: f32[32,128], index: 5, kind: output, shape index: {}]  }
   0x1   :  { %12 = vsyncpa [#allocation3 + $0x1], 0  ;;  %s631_s18 = smov 0   ;;  %s633_s19 = smov 0  }
   0x2   :  { %s635_s20 = smov 0   ;;  %s637_s21 = smov 0  }
   0x3 LB: > { %s652_s22 = sadd.s32 4294967295, %s594_s21   ;;  %s443_s23 = sadd.s32 4294967294, %s594_s21   ;;  %s594_s21 = sphi %s637_s21, %s770_s21   ;;  %s590_s20 = sphi %s635_s20, %s769_s20   ;;  %s586_s19 = sphi %s633_s19, %s768_s19   ;;  %s582_s18 = sphi %s631_s18, %s767_s18  }
   0x4   : > { %s656_s24 = sadd.s32 1, %s594_s21   ;;  %s135_s25 = sadd.s32 1, %s590_s20 }
   0x5   : > { %s132_s26 = ssub.s32 %s594_s21, %s656_s24  ;;  %p145_p0 = scmp.ne.s32.totalorder %s590_s20, %s586_s19 }
   0x6   : > { %p133_p1 = scmp.eq.s32.totalorder %s132_s26, 0  ;;  %p146_p2 = scmp.eq.s32.totalorder %s652_s22, 1 }
   0x7   : > { %p151_p3 = scmp.ne.s32.totalorder %s586_s19, %s582_s18  ;;  %p152_p4 = scmp.eq.s32.totalorder %s443_s23, 1 }
   0x8   : > { %s667_s27 = scalar_select %p133_p1, %s590_s20, %s135_s25  }
   0x9   : > { %p669_p5 = por %p146_p2, %p145_p0  ;;  %p673_p6 = por %p152_p4, %p151_p3 }
   0xa   : > { %p446_p7 = scmp.ge.s32.totalorder %s594_s21, 1  ;;  %p191_p8 = scmp.lt.s32.totalorder %s594_s21, 3 }
   0xc   : > { %p192_p9 = pnand %p446_p7, %p191_p8 }
   0xd   : > { %s448_s30 = sshll.u32 (!%p192_p9), %s652_s22, 1  ;;  %vm229_vm0 = vcmask (!%p192_p9), 523264   ;;  %v524_v8 = vld [vmem:[%s762_s3] sm:$0xff] (!%p192_p9)   ;;  %v596_v9 = vmov (!%p192_p9), 0.0   ;;  %vm597_vm1 = vmmov (!%p192_p9), 0   ;;  %v525_v10 = vld [vmem:[%s762_s3 + $0x8] sm:$0xff] (!%p192_p9)  }
   0xe   : > { %195 = sbr.rel (%p192_p9) target bundleno = 432 (0x1b0), region = 40  ;;  %p220_p10 = scmp.lt.s32.totalorder (!%p192_p9), %s448_s30, 3  ;;  %469 = vmatprep.subr.bf16.mxu0 (!%p192_p9), %v596_v9  ;;  %477 = vmatprep.mubr.msk.bf16.mxu0 (!%p192_p9), %vm597_vm1, %v596_v9  ;;  %v526_v11 = vld [vmem:[%s762_s3 + $0x10] sm:$0xff] (!%p192_p9)   ;;  %v527_v12 = vld [vmem:[%s762_s3 + $0x18] sm:$0xff] (!%p192_p9)   ;;  %v450_v32 = vld [vmem:[%s760_s1] ss:$0 sm:$0xff] (!%p192_p9) }
   0xf   : > { %470 = vmatpush3.bf16.msra.mxu0 (!%p192_p9), %v524_v8  ;;  %v451_v37 = vld [vmem:[%s761_s2] ss:$0 sm:$0xff] (!%p192_p9)  ;;  %s463_s12 = sshll.u32 (!%p192_p9), %s652_s22, 8  ;;  %s598_s17 = smov (!%p192_p9), [#allocation2]  }
  0x10   : > { %471 = vmatprep.subr.bf16.mxu0 (!%p192_p9), %v596_v9  ;;  %v452_v42 = vld [vmem:[%s763_s4] ss:$0 sm:$0xff] (!%p192_p9)  ;;  %s716_s15 = scalar_lea.hbm (!%p192_p9), %s764_s5, %s463_s12  ;;  %s536_s23 = sshll.u32 (!%p192_p9), %s598_s17, 4  ;;  %s537_s23 = int_to_ptr.vmem [resolvable:$false] %s536_s23 }
  0x11   : > { %s538_s25 = scalar_lea.vmem (!%p192_p9), %s537_s23, 512 }
  0x13   : > { %472 = vmatpush3.bf16.msra.mxu0 (!%p192_p9), %v525_v10 }
  0x14   : > { %473 = vmatprep.subr.bf16.mxu0 (!%p192_p9), %v596_v9 }
  0x15   : > { %s772_s30 = smov (!%p220_p10, %s448_s30), 3 }
  0x16   : > { %s449_s6 = sshll.u32 %s772_s30, 3 }
  0x17   : > { %s223_s9 = scalar_lea.vmem %s759_s0, %s449_s6  ;;  %474 = vmatpush3.bf16.msra.mxu0 %v526_v11  ;;  %s216_s6 = sand.u32 1, %s586_s19  }
  0x18   : > { %v227_v0 = vld [vmem:[%s223_s9] sm:$0xff]  ;;  %v228_v1 = vld [vmem:[%s223_s9 + $0x8] sm:$0xff]  ;;  %475 = vmatprep.subr.bf16.mxu0 %v596_v9  ;;  %s447_s7 = sshll.u32 %s216_s6, 4  ;;  %s718_s16 = scalar_lea.sflag [#allocation3], %s216_s6 }
  0x19   : > { %v230_v2 = vsel %vm229_vm0, %v227_v0, 0.0  ;;  %v239_v3 = vmul.f32 %v227_v0, %v227_v0  ;;  %v240_v4 = vmul.f32 %v228_v1, %v228_v1  ;;  %v233_v6 = vsel %vm229_vm0, %v228_v1, 0.0  ;;  %s218_s10 = scalar_lea.vmem [#allocation2], %s447_s7 }
  0x1a   : > { %231 = vadd.xlane.f32.xlu0 %v230_v2  ;;  %s381_s11 = sshll.u32 %s218_s10, 4  ;;  %s711_s11 = int_to_ptr.vmem [resolvable:$true] %s381_s11 }
  0x1b   : > { %v241_v5 = vsel %vm229_vm0, %v239_v3, 0.0  ;;  %v244_v7 = vsel %vm229_vm0, %v240_v4, 0.0  ;;  %476 = vmatpush3.bf16.msra.mxu0 %v527_v12  ;;  %s532_s22 = scalar_lea.vmem %s711_s11, 256  ;;  %p539_p0 = scmp.lt.s32.totalorder %s711_s11, %s537_s23 }
  0x1c   : > { %242 = vadd.xlane.f32.xlu1 %v241_v5  ;;  %p533_p11 = scmp.ne.s32.totalorder %s711_s11, %s532_s22  ;;  %p540_p1 = scmp.lt.s32.totalorder %s538_s25, %s532_s22 }
  0x1e   : > { %234 = vadd.xlane.f32.xlu0 %v233_v6  ;;  %p534_p12 = pnand %p533_p11, %p669_p5  ;;  %p541_p2 = por %p540_p1, %p539_p0 }
  0x20   : > { %245 = vadd.xlane.f32.xlu1 %v244_v7  ;;  %p535_p13 = pneg %p534_p12 }
  0x22   : > { %p542_p3 = pnand %p541_p2, %p535_p13 }
  0xa7   : > { %v232_v13 = vpop.xlane.xlu0 %231 }
  0xa8   : > { %v237_v14 = vmul.f32 0.015625, %v232_v13 }
  0xa9   : > { %v243_v15 = vpop.xlane.xlu1 %242 }
  0xaa   : > { %v249_v16 = vmul.f32 %v237_v14, %v237_v14  ;;  %v247_v17 = vmul.f32 0.015625, %v243_v15  ;;  %v255_v29 = vsub.f32 %v227_v0, %v237_v14 }
  0xab   : > { %v235_v18 = vpop.xlane.xlu0 %234 }
  0xac   : > { %v251_v19 = vsub.f32 %v247_v17, %v249_v16  ;;  %v238_v20 = vmul.f32 0.015625, %v235_v18 }
  0xad   : > { %v246_v21 = vpop.xlane.xlu1 %245 }
  0xae   : > { %v253_v22 = vmax.f32 %v251_v19, 0.0  ;;  %v250_v23 = vmul.f32 %v238_v20, %v238_v20  ;;  %v248_v24 = vmul.f32 0.015625, %v246_v21  ;;  %v256_v33 = vsub.f32 %v228_v1, %v238_v20 }
  0xb0   : > { %v257_v25 = vadd.f32 1e-05, %v253_v22  ;;  %v252_v26 = vsub.f32 %v248_v24, %v250_v23 }
  0xb2   : > { %528 = vrsqrt.f32 %v257_v25  ;;  %v254_v27 = vmax.f32 %v252_v26, 0.0 }
  0xb4   : > { %v258_v28 = vadd.f32 1e-05, %v254_v27 }
  0xb6   : > { %530 = vrsqrt.f32 %v258_v28 }
  0xbc   : > { %v529_v30 = vpop.eup %528 }
  0xbd   : > { %v261_v31 = vmul.f32 %v529_v30, %v255_v29 }
  0xbf   : > { %v270_v36 = vmul.f32 %v450_v32, %v261_v31 }
  0xc0   : > { %v531_v34 = vpop.eup %530 }
  0xc1   : > { %v262_v35 = vmul.f32 %v531_v34, %v256_v33  ;;  %v279_v39 = vadd.f32 %v451_v37, %v270_v36 }
  0xc3   : > { %v271_v38 = vmul.f32 %v450_v32, %v262_v35 }
  0xc5   : > { %v280_v40 = vadd.f32 %v451_v37, %v271_v38 }
  0xc7   : > { %v281_v41 = vpack.c.bf16 %v280_v40, %v279_v39 }
  0xc9   : > { %478 = vmatmul.mubr.msk.bf16.vlgmr.msra.gmra.mrb[0].mxu0 %vm229_vm0, %v281_v41 }
 0x19c   : > { %v358_v43 = vpop.f32.mrb[0].mxu0 }
 0x19d   : > { %v359_v44 = vadd.f32 %v452_v42, %v358_v43  ;;  %v479_v45 = vpop.f32.mrb[1].mxu0 }
 0x19e   : > { %v361_v46 = vpop.f32.mrb[2].mxu0 }
 0x19f   : > { %365 = vst [vmem:[%s218_s10] sm:$0xff] %v359_v44  ;;  %v362_v47 = vadd.f32 %v452_v42, %v361_v46  ;;  %v480_v48 = vpop.f32.mrb[3].mxu0 }
 0x1a1   : > { %366 = vst [vmem:[%s218_s10 + $0x8] sm:$0xff] %v362_v47 }
 0x1a2   : > { %545 = shalt.err (!%p542_p3)
}
 0x1a3   : > { %s546_s26 = scalar_lea.hbm %s716_s15, 256  ;;  %s550_s7 = scalar_lea.hbm %s764_s5, 512 }
 0x1a4   : > { %p547_p4 = scmp.ne.s32.totalorder %s716_s15, %s546_s26  ;;  %p551_p9 = scmp.lt.u32.totalorder %s716_s15, %s764_s5 }
 0x1a5   : > { %p552_p10 = scmp.lt.u32.totalorder %s550_s7, %s546_s26  ;;  %p554_p12 = scmp.lt.u32.totalorder %s546_s26, %s716_s15 }
 0x1a6   : > { %p548_p7 = pnand %p547_p4, %p669_p5 }
 0x1a7   : > { %p553_p11 = por %p552_p10, %p551_p9 }
 0x1a8   : > { %p549_p8 = pneg %p548_p7 }
 0x1a9   : > { %p555_p13 = por %p554_p12, %p553_p11 }
 0x1ab   : > { %p556_p0 = pnand %p555_p13, %p549_p8 }
 0x1ad   : > { %559 = shalt.err (!%p556_p0)
}
 0x1ae   : > { %s599_s10 = smov 128   ;;  %s600_s12 = smov 8  }
 0x1af   : > { %481 = dma.vmem_to_hbm [thread:$0]  (%p669_p5), %s711_s11, 256, %s716_s15, %s718_s16, %s599_s10, %s599_s10, %s600_s12  }
 0x1b0 PF: > { %p487_p1 = scmp.ge.s32.totalorder %s594_s21, 2  ;;  %s396_s13 = sand.u32 1, %s582_s18  }
 0x1b1   : > { %s397_s14 = scalar_lea.sflag [#allocation3], %s396_s13 }
 0x1b2   : > { %p484_p2 = pnand %p487_p1, %p673_p6 }
 0x1b4   : > { %577 = dma.done.wait (!%p484_p2), %s397_s14, 256  }
 0x1b5   : > { %579 = vsyncadd (!%p484_p2), %s397_s14, 4294967040  ;;  %p15_p3 = scmp.ge.s32.totalorder %s656_s24, 4   ;;  %s767_s18 = smov %s586_s19 }
 0x1b6   : > { %s768_s19 = smov %s590_s20  ;;  %s769_s20 = smov %s667_s27 }
 0x1b7   : > { %s770_s21 = smov %s656_s24  ;;  %17 = sbr.rel (!%p15_p3) target bundleno = 3 (0x3), region = 75 }
 0x1be   :  { %402 = vsyncpa [#allocation3], 1 }
 0x1bf   :  { %404 = vsyncpa [#allocation3 + $0x1], 1 }

</bundles_post_ra>
